<compile_context>
chip_gen: v5e
topology: v5e:2x2
jax: 0.10.0
libtpu: 0.0.40
codegen_flags: <defaults>
</compile_context>

<pallas_src>
import math
import functools

import jax
import jax.numpy as jnp
from jax import lax
from jax.experimental import pallas as pl
from jax.experimental.pallas import tpu as pltpu


_VMEM_LIMIT_BYTES = 32 * 1024 * 1024     # safe scoped-VMEM limit on v5e/v6e/v7x
_TARGET_BLOCK_BYTES = 2 * 1024 * 1024    # ~2 MiB per x tile (double-buffered)


def make_positional_encoding(seq_len: int, d_model: int) -> jnp.ndarray:
    """Deterministic buffer, identical to the PyTorch __init__ construction."""
    position = jnp.arange(seq_len, dtype=jnp.float32)[:, None]               # (S, 1)
    div_term = jnp.exp(
        jnp.arange(0, d_model, 2, dtype=jnp.float32) * (-math.log(10000.0) / d_model)
    )                                                                        # (D/2,)
    pe = jnp.zeros((seq_len, d_model), dtype=jnp.float32)
    pe = pe.at[:, 0::2].set(jnp.sin(position * div_term))
    pe = pe.at[:, 1::2].set(jnp.cos(position * div_term))
    return pe                                                                # (S, D)


def _eval_kernel(x_ref, pe_ref, o_ref):
    # x_ref: (Bt, Rt, C); pe_ref: (Rt, C) broadcast over the batch block dim.
    o_ref[...] = (x_ref[...] + pe_ref[...][None, :, :]).astype(o_ref.dtype)


def _make_train_kernel(p: float, Bt: int, Rt: int, C: int, R: int):
    """Inverted dropout: out = (x + pe) * keep_mask / (1 - p)."""
    keep_scale = 1.0 / (1.0 - p)

    def kernel(seed_ref, x_ref, pe_ref, o_ref):
        y = x_ref[...] + pe_ref[...][None, :, :]
        shape = y.shape  # (Bt, Rt, C)

        # Global flat element index (independent of the chosen tiling).
        # NOTE: wraps for tensors > 2^31 elements; hash still valid as a mask.
        b_idx = pl.program_id(0) * Bt + lax.broadcasted_iota(jnp.int32, shape, 0)
        r_idx = pl.program_id(1) * Rt + lax.broadcasted_iota(jnp.int32, shape, 1)
        c_idx = lax.broadcasted_iota(jnp.int32, shape, 2)
        h = (b_idx * jnp.int32(R) + r_idx) * jnp.int32(C) + c_idx

        # Mix in the seed and apply a cheap lowbias32-style integer hash.
        # (arithmetic shift + mask == logical shift; all plain int32 VPU ops)
        h = h ^ (seed_ref[0] * jnp.int32(0x2C9277B5))
        h = (h ^ ((h >> 16) & 0xFFFF)) * jnp.int32(0x045D9F3B)
        h = (h ^ ((h >> 16) & 0xFFFF)) * jnp.int32(0x045D9F3B)
        h = h ^ ((h >> 16) & 0xFFFF)

        # 24 uniform bits -> uniform [0, 1); keep with probability (1 - p).
        u = ((h >> 8) & 0xFFFFFF).astype(jnp.float32) * jnp.float32(1.0 / (1 << 24))
        keep = (u >= jnp.float32(p)).astype(y.dtype)
        o_ref[...] = (y * (keep * jnp.asarray(keep_scale, y.dtype))).astype(o_ref.dtype)

    return kernel


def _pick_tiles(B: int, R: int, C: int, itemsize: int):
    """Pick (Bt, Rt) so an x block is ~_TARGET_BLOCK_BYTES and obeys the
    (8, 128) block rule (Rt multiple of 8 or full extent; C is always full/128)."""
    row_bytes = C * itemsize
    plane_bytes = R * row_bytes
    if plane_bytes <= _TARGET_BLOCK_BYTES:
        Rt = R
        Bt = min(B, max(1, _TARGET_BLOCK_BYTES // plane_bytes))
    else:
        Bt = 1
        Rt = max(8, (_TARGET_BLOCK_BYTES // row_bytes) // 8 * 8)
        Rt = min(Rt, R)
        if Rt != R and Rt % 8 != 0:
            Rt = R
    return int(Bt), int(Rt)


@functools.partial(jax.jit, static_argnames=("dropout_p", "train"))
def positional_encoding_forward(x, pe, seed=None, *, dropout_p: float = 0.0,
                                train: bool = False):
    """x: (B, L, D); pe: (seq_len, D) with seq_len >= L; seed: int32 (1,) array
    (only used when train=True and dropout_p > 0)."""
    B, L, D = x.shape
    pe_l = pe[:L, :].astype(x.dtype)            # == pe[:, :x.shape[1], :]

    use_dropout = bool(train) and dropout_p > 0.0
    if use_dropout and dropout_p >= 1.0:
        # nn.Dropout(p=1.0): everything is dropped.
        return jnp.zeros_like(x)

    # Lane-dense view: flatten the (L, D) plane into (R, 128) rows if possible.
    if (L * D) % 128 == 0:
        C = 128
        R = (L * D) // 128
    else:
        C = D
        R = L
    x_v = x.reshape(B, R, C)
    pe_v = pe_l.reshape(R, C)

    itemsize = jnp.dtype(x.dtype).itemsize
    Bt, Rt = _pick_tiles(B, R, C, itemsize)
    grid = (pl.cdiv(B, Bt), pl.cdiv(R, Rt))

    compiler_params = pltpu.CompilerParams(
        dimension_semantics=("parallel", "parallel"),
        vmem_limit_bytes=_VMEM_LIMIT_BYTES,
    )
    out_shape = jax.ShapeDtypeStruct((B, R, C), x.dtype)

    if not use_dropout:
        # Eval / p == 0: pure elementwise add, no scalar prefetch at all.
        grid_spec = pl.GridSpec(
            grid=grid,
            in_specs=[
                pl.BlockSpec((Bt, Rt, C), lambda b, r: (b, r, 0)),   # x tile
                pl.BlockSpec((Rt, C), lambda b, r: (r, 0)),          # pe tile
            ],
            out_specs=pl.BlockSpec((Bt, Rt, C), lambda b, r: (b, r, 0)),
        )
        out_v = pl.pallas_call(
            _eval_kernel,
            grid_spec=grid_spec,
            out_shape=out_shape,
            compiler_params=compiler_params,
        )(x_v, pe_v)
    else:
        if seed is None:
            raise ValueError("seed is required when train=True and dropout_p > 0")
        seed = jnp.asarray(seed, jnp.int32).reshape((1,))
        kernel = _make_train_kernel(float(dropout_p), Bt, Rt, C, R)
        grid_spec = pltpu.PrefetchScalarGridSpec(
            num_scalar_prefetch=1,
            grid=grid,
            in_specs=[
                pl.BlockSpec((Bt, Rt, C), lambda b, r, s: (b, r, 0)),  # x tile
                pl.BlockSpec((Rt, C), lambda b, r, s: (r, 0)),         # pe tile
            ],
            out_specs=pl.BlockSpec((Bt, Rt, C), lambda b, r, s: (b, r, 0)),
        )
        out_v = pl.pallas_call(
            kernel,
            grid_spec=grid_spec,
            out_shape=out_shape,
            compiler_params=compiler_params,
        )(seed, x_v, pe_v)

    return out_v.reshape(B, L, D)


if __name__ == "__main__":
    # Small shapes consistent with the module: batch=2, seq=8, d_model=32
    B, SEQ_LEN, D_MODEL = 2, 8, 32
    DROPOUT_P = 0.1

    key = jax.random.PRNGKey(0)
    x = jax.random.normal(key, (B, SEQ_LEN, D_MODEL), dtype=jnp.float32)
    pe = make_positional_encoding(SEQ_LEN, D_MODEL)
    seed = jnp.array([0], dtype=jnp.int32)

    ref = x + pe[None, :SEQ_LEN, :]

    # --- eval mode (dropout == identity), check against reference ---
    y_eval = positional_encoding_forward(x, pe, seed, dropout_p=DROPOUT_P, train=False)
    jax.block_until_ready(y_eval)
    assert jnp.allclose(y_eval, ref, atol=1e-6, rtol=1e-6), "eval mismatch"

    # --- train mode (in-kernel hash dropout), sanity check only ---
    y_train = positional_encoding_forward(x, pe, seed, dropout_p=DROPOUT_P, train=True)
    jax.block_until_ready(y_train)
    # dropped elements are exactly zero; kept ones are scaled by 1/(1-p)
    kept = y_train != 0.0
    assert jnp.allclose(
        jnp.where(kept, y_train, 0.0),
        jnp.where(kept, ref / (1.0 - DROPOUT_P), 0.0),
        atol=1e-5,
        rtol=1e-5,
    ), "train-mode scaling mismatch"

    print("KERNEL_OK")
</pallas_src>

<mosaic_0001>
module attributes {stable_mosaic.version = 11 : i64} {
  func.func @_eval_kernel(%arg0: i32, %arg1: i32, %arg2: memref<2x2x128xf32, #tpu.memory_space<vmem>>, %arg3: memref<2x128xf32, #tpu.memory_space<vmem>>, %arg4: memref<2x2x128xf32, #tpu.memory_space<vmem>>) attributes {dimension_semantics = [#tpu.dimension_semantics<parallel>, #tpu.dimension_semantics<parallel>], iteration_bounds = array<i64: 1, 1>, scalar_prefetch = 0 : i64, scratch_operands = 0 : i64, tpu.core_type = #tpu.core_type<tc>, window_params = [{transform_indices = @transform_0, window_bounds = array<i64: 2, 2, 128>}, {transform_indices = @transform_1, window_bounds = array<i64: 2, 128>}, {transform_indices = @transform_2, window_bounds = array<i64: 2, 2, 128>}]} {
    %c0 = arith.constant 0 : index
    %c0_0 = arith.constant 0 : index
    %c0_1 = arith.constant 0 : index
    %0 = vector.load %arg2[%c0, %c0_0, %c0_1] : memref<2x2x128xf32, #tpu.memory_space<vmem>>, vector<2x2x128xf32>
    %c0_2 = arith.constant 0 : index
    %c0_3 = arith.constant 0 : index
    %1 = vector.load %arg3[%c0_2, %c0_3] : memref<2x128xf32, #tpu.memory_space<vmem>>, vector<2x128xf32>
    %2 = vector.shape_cast %1 : vector<2x128xf32> to vector<1x2x128xf32>
    %3 = vector.broadcast %2 : vector<1x2x128xf32> to vector<2x2x128xf32>
    %4 = arith.addf %0, %3 : vector<2x2x128xf32>
    %c0_4 = arith.constant 0 : index
    %c0_5 = arith.constant 0 : index
    %c0_6 = arith.constant 0 : index
    %5 = vector.load %arg4[%c0_4, %c0_5, %c0_6] : memref<2x2x128xf32, #tpu.memory_space<vmem>>, vector<2x2x128xf32>
    tpu.vector_store %arg4[%c0_4, %c0_5, %c0_6], %4 {strides = array<i32>} : memref<2x2x128xf32, #tpu.memory_space<vmem>>, vector<2x2x128xf32>,
    return
  }
  func.func @transform_0(%arg0: i32, %arg1: i32) -> (i32, i32, i32) {
    %c0_i32 = arith.constant 0 : i32
    %c0_i32_0 = arith.constant 0 : i32
    return %arg0, %arg1, %c0_i32 : i32, i32, i32
  }
  func.func @transform_1(%arg0: i32, %arg1: i32) -> (i32, i32) {
    %c0_i32 = arith.constant 0 : i32
    %c0_i32_0 = arith.constant 0 : i32
    return %arg1, %c0_i32 : i32, i32
  }
  func.func @transform_2(%arg0: i32, %arg1: i32) -> (i32, i32, i32) {
    %c0_i32 = arith.constant 0 : i32
    %c0_i32_0 = arith.constant 0 : i32
    return %arg0, %arg1, %c0_i32 : i32, i32, i32
  }
}

</mosaic_0001>

<bundles_post_ra>
// kernel: positional_encoding_forward.1
= control target key start
LH: loop header
LB: loop body
LE: loop exit
PB: predicated region body
PF: predicated region fallthrough
CT: control target
= control target key end

     0   :  { %s52_s0 = inlined_call_operand.vmem [shape: f32[2,2,128], index: 0, kind: input, shape index: {}]   ;;  %s53_s1 = inlined_call_operand.vmem [shape: f32[2,128], index: 1, kind: input, shape index: {}]   ;;  %s54_s2 = inlined_call_operand.vmem [shape: f32[2,2,128], index: 2, kind: output, shape index: {}]  }
   0x1   :  { %v11_v0 = vld [vmem:[%s52_s0] sm:$0x3]  ;;  %v12_v2 = vld [vmem:[%s52_s0 + $0x2] sm:$0x3] }
   0x2   :  { %v13_v1 = vld [vmem:[%s53_s1] sm:$0x3] }
   0x3   :  { %v14_v3 = vadd.f32 %v13_v1, %v11_v0  ;;  %v15_v4 = vadd.f32 %v13_v1, %v12_v2 }
   0x5   :  { %16 = vst [vmem:[%s54_s2] sm:$0x3] %v14_v3 }
   0x6   :  { %17 = vst [vmem:[%s54_s2 + $0x2] sm:$0x3] %v15_v4 }

</bundles_post_ra>
